<compile_context>
chip_gen: v6e
topology: v6e:2x2x1
jax: 0.10.0
libtpu: 0.0.40
codegen_flags: <defaults>
</compile_context>

<pallas_src>
import jax
import jax.numpy as jnp
from jax.experimental import pallas as pl
from jax.experimental.pallas import tpu as pltpu


def _decoder_tcn_kernel(x_ref, wc_ref, bc_ref, o_ref):
    """One grid step == (one batch element, one output-time tile).

    x_ref  : (1, T, Cin)        full input sequence for this batch element (NTC)
    wc_ref : (M, Cin, 2*Cout)   phase-folded conv taps (lanes = [even Cout | odd Cout])
    bc_ref : (1, 2*Cout)        bias duplicated for the two phases
    o_ref  : (1, tS, 2*Cout)    output tile; lanes = [even-phase Cout | odd-phase Cout]
    """
    n_taps = wc_ref.shape[0]
    tile_s = o_ref.shape[1]
    cout2 = o_ref.shape[2]
    cout = cout2 // 2

    start = pl.program_id(1) * tile_s
    if tile_s % 8 == 0:
        start = pl.multiple_of(start, 8)

    # Upsample+conv as M shifted MXU matmuls, f32 accumulation.
    acc = jnp.dot(x_ref[0, pl.ds(start, tile_s), :], wc_ref[0],
                  preferred_element_type=jnp.float32)
    for m in range(1, n_taps):
        acc = acc + jnp.dot(x_ref[0, pl.ds(start + m, tile_s), :], wc_ref[m],
                            preferred_element_type=jnp.float32)
    acc = acc + bc_ref[...]

    # TODO(synk): nn.Dropout2d(0.3) is identity in eval mode; training-mode
    # channel dropout would need pltpu.prng_seed / pltpu.prng_random_bits here.

    # Norm_Relu: relu, then divide by (max over channels + 1e-5), per phase.
    r = jnp.maximum(acc, 0.0)
    lane = jax.lax.broadcasted_iota(jnp.int32, r.shape, dimension=1)
    is_even = lane < cout
    m_even = jnp.max(jnp.where(is_even, r, 0.0), axis=-1, keepdims=True)
    m_odd = jnp.max(jnp.where(is_even, 0.0, r), axis=-1, keepdims=True)
    denom = jnp.where(is_even, m_even, m_odd) + 1e-5
    o_ref[0] = (r / denom).astype(o_ref.dtype)


def _fold_upsample_into_weights(w, b):
    """Fold the nearest-neighbour 2x upsample into the Conv1d weights.

    w: (Cout, Cin, K) with K odd.  Returns wc (M, Cin, 2*Cout), bc (1, 2*Cout)
    with M = (K+1)//2 such that
        conv(upsample2(x))[2s + p, co] = b[co] + sum_m x[s+m] @ wc[m, :, p*Cout + co]
    """
    cout, _, K = w.shape
    M = (K + 1) // 2
    w_t = jnp.transpose(w, (2, 1, 0))                      # (K, Cin, Cout)
    taps = []
    for m in range(M):
        we = w_t[2 * m]
        if 2 * m + 1 < K:
            we = we + w_t[2 * m + 1]
        wo = w_t[2 * m]
        if 2 * m - 1 >= 0:
            wo = wo + w_t[2 * m - 1]
        taps.append(jnp.concatenate([we, wo], axis=-1))    # (Cin, 2*Cout)
    wc = jnp.stack(taps, axis=0)                           # (M, Cin, 2*Cout)
    bc = jnp.concatenate([b, b]).reshape(1, 2 * cout)
    return wc, bc


def _pick_time_tile(sh, max_tile):
    """Largest multiple-of-8 divisor of `sh` not exceeding max_tile (else sh)."""
    if sh <= max_tile:
        return sh
    for cand in range(min(max_tile, sh), 7, -1):
        if cand % 8 == 0 and sh % cand == 0:
            return cand
    return sh


def decoder_tcn_forward(x_nct, params, *, kernel_size, max_time_tile=512):
    """x_nct: (N, Cin, T) float32.  Returns (N, Cout, 2*T - kernel_size + 1)."""
    N, Cin, T = x_nct.shape
    K = int(kernel_size)
    if K % 2 != 1:
        raise NotImplementedError("even kernel_size not supported by the phase-packed kernel")
    w, b = params["w"], params["b"]
    Cout = w.shape[0]
    assert w.shape == (Cout, Cin, K) and b.shape == (Cout,)
    Tout = 2 * T - K + 1
    assert Tout >= 2
    M = (K + 1) // 2
    Sh = Tout // 2                                  # number of (even, odd) output pairs

    wc, bc = _fold_upsample_into_weights(w, b)
    x_ntc = jnp.transpose(x_nct, (0, 2, 1))         # (N, T, Cin) — single transpose in

    # Time-tile sizing; max_time_tile keeps per-step VMEM modest (re-derive for
    # v7x's 64 MiB budget by lowering it if T/Cout are large).
    tile_s = _pick_time_tile(Sh, max_time_tile)
    n_s = Sh // tile_s

    out_packed = pl.pallas_call(
        _decoder_tcn_kernel,
        out_shape=jax.ShapeDtypeStruct((N, Sh, 2 * Cout), x_ntc.dtype),
        grid_spec=pltpu.PrefetchScalarGridSpec(
            num_scalar_prefetch=0,
            grid=(N, n_s),
            in_specs=[
                pl.BlockSpec((1, T, Cin), lambda bi, si: (bi, 0, 0)),        # x, resident across time tiles
                pl.BlockSpec((M, Cin, 2 * Cout), lambda bi, si: (0, 0, 0)),  # folded weights
                pl.BlockSpec((1, 2 * Cout), lambda bi, si: (0, 0)),          # folded bias
            ],
            out_specs=pl.BlockSpec((1, tile_s, 2 * Cout), lambda bi, si: (bi, si, 0)),
        ),
        compiler_params=pltpu.CompilerParams(
            dimension_semantics=("parallel", "parallel")),
    )(x_ntc, wc, bc)

    # (N, Sh, 2*Cout) -> (N, Tout, Cout): phases were packed along lanes in
    # exactly interleaved time order, so this reshape is free (row-major no-op).
    out_ntc = out_packed.reshape(N, Tout, Cout)
    return jnp.transpose(out_ntc, (0, 2, 1))        # back to NCT


def reference_forward(x_nct, params, *, kernel_size):
    """Pure-JAX reference (eval mode: Dropout2d = identity)."""
    x_up = jnp.repeat(x_nct, 2, axis=2)                         # nearest-neighbour 2x upsample
    y = jax.lax.conv_general_dilated(
        x_up, params["w"], window_strides=(1,), padding=[(0, 0)],
        dimension_numbers=("NCH", "OIH", "NCH"),
    ) + params["b"][None, :, None]
    r = jax.nn.relu(y)
    mx = jnp.max(r, axis=1, keepdims=True)                      # Norm_Relu, dim=1
    return r / (mx + 1e-5)


if __name__ == "__main__":
    N, Cin, Cout, T, K = 2, 16, 8, 33, 3

    key = jax.random.PRNGKey(0)
    k1, k2, k3 = jax.random.split(key, 3)
    params = {
        "w": jax.random.normal(k1, (Cout, Cin, K), jnp.float32) * 0.1,   # conv.weight
        "b": jax.random.normal(k2, (Cout,), jnp.float32) * 0.1,          # conv.bias
    }
    x = jax.random.normal(k3, (N, Cin, T), jnp.float32)

    # max_time_tile=16 so even this small demo exercises the time-tiled grid (n_s > 1).
    out = decoder_tcn_forward(x, params, kernel_size=K, max_time_tile=16)
    out = jax.block_until_ready(out)

    ref = reference_forward(x, params, kernel_size=K)
    assert out.shape == (N, Cout, 2 * T - K + 1)
    assert jnp.allclose(out, ref, atol=1e-4, rtol=1e-4), "mismatch vs reference"

    print("KERNEL_OK")
</pallas_src>

<mosaic_0001>
module attributes {stable_mosaic.version = 11 : i64} {
  func.func @_decoder_tcn_kernel(%arg0: i32, %arg1: i32, %arg2: memref<1x33x16xf32, #tpu.memory_space<vmem>>, %arg3: memref<2x16x16xf32, #tpu.memory_space<vmem>>, %arg4: memref<1x16xf32, #tpu.memory_space<vmem>>, %arg5: memref<1x16x16xf32, #tpu.memory_space<vmem>>) attributes {dimension_semantics = [#tpu.dimension_semantics<parallel>, #tpu.dimension_semantics<parallel>], iteration_bounds = array<i64: 2, 2>, scalar_prefetch = 0 : i64, scratch_operands = 0 : i64, tpu.core_type = #tpu.core_type<tc>, window_params = [{transform_indices = @transform_0, window_bounds = array<i64: 1, 33, 16>}, {pipeline_mode = #tpu.pipeline_mode<synchronous>, transform_indices = @transform_1, window_bounds = array<i64: 2, 16, 16>}, {pipeline_mode = #tpu.pipeline_mode<synchronous>, transform_indices = @transform_2, window_bounds = array<i64: 1, 16>}, {transform_indices = @transform_3, window_bounds = array<i64: 1, 16, 16>}]} {
    %c16_i32 = arith.constant 16 : i32
    %0 = arith.muli %arg1, %c16_i32 : i32
    %1 = tpu.assume_multiple %0, 8 : i32
    %c0 = arith.constant 0 : index
    %2 = arith.index_cast %1 : i32 to index
    %c0_0 = arith.constant 0 : index
    %3 = vector.load %arg2[%c0, %2, %c0_0] : memref<1x33x16xf32, #tpu.memory_space<vmem>>, vector<1x16x16xf32>
    %4 = vector.shape_cast %3 : vector<1x16x16xf32> to vector<16x16xf32>
    %c0_1 = arith.constant 0 : index
    %c0_2 = arith.constant 0 : index
    %c0_3 = arith.constant 0 : index
    %5 = vector.load %arg3[%c0_1, %c0_2, %c0_3] : memref<2x16x16xf32, #tpu.memory_space<vmem>>, vector<1x16x16xf32>
    %6 = vector.shape_cast %5 : vector<1x16x16xf32> to vector<16x16xf32>
    %cst = arith.constant dense<0.000000e+00> : vector<16x16xf32>
    %7 = tpu.matmul %4, %6, %cst {dimension_numbers = #tpu.dot_dimension_numbers<[1], [0], [0], [1], [0, 0, 1, 1], [], []>} : vector<16x16xf32>, vector<16x16xf32>, vector<16x16xf32> -> vector<16x16xf32>
    %c1_i32 = arith.constant 1 : i32
    %8 = arith.addi %1, %c1_i32 : i32
    %c0_4 = arith.constant 0 : index
    %9 = arith.index_cast %8 : i32 to index
    %c0_5 = arith.constant 0 : index
    %10 = vector.load %arg2[%c0_4, %9, %c0_5] : memref<1x33x16xf32, #tpu.memory_space<vmem>>, vector<1x16x16xf32>
    %11 = vector.shape_cast %10 : vector<1x16x16xf32> to vector<16x16xf32>
    %c1 = arith.constant 1 : index
    %c0_6 = arith.constant 0 : index
    %c0_7 = arith.constant 0 : index
    %12 = vector.load %arg3[%c1, %c0_6, %c0_7] : memref<2x16x16xf32, #tpu.memory_space<vmem>>, vector<1x16x16xf32>
    %13 = vector.shape_cast %12 : vector<1x16x16xf32> to vector<16x16xf32>
    %cst_8 = arith.constant dense<0.000000e+00> : vector<16x16xf32>
    %14 = tpu.matmul %11, %13, %cst_8 {dimension_numbers = #tpu.dot_dimension_numbers<[1], [0], [0], [1], [0, 0, 1, 1], [], []>} : vector<16x16xf32>, vector<16x16xf32>, vector<16x16xf32> -> vector<16x16xf32>
    %15 = arith.addf %7, %14 : vector<16x16xf32>
    %c0_9 = arith.constant 0 : index
    %c0_10 = arith.constant 0 : index
    %16 = vector.load %arg4[%c0_9, %c0_10] : memref<1x16xf32, #tpu.memory_space<vmem>>, vector<1x16xf32>
    %17 = vector.broadcast %16 : vector<1x16xf32> to vector<16x16xf32>
    %18 = arith.addf %15, %17 : vector<16x16xf32>
    %cst_11 = arith.constant 0.000000e+00 : f32
    %19 = vector.broadcast %cst_11 : f32 to vector<16x16xf32>
    %20 = arith.maximumf %18, %19 : vector<16x16xf32>
    %21 = tpu.iota {dimensions = array<i32: 1>} : vector<16x16xi32>
    %c8_i32 = arith.constant 8 : i32
    %22 = vector.broadcast %c8_i32 : i32 to vector<16x16xi32>
    %23 = arith.cmpi slt, %21, %22 : vector<16x16xi32>
    %cst_12 = arith.constant 0.000000e+00 : f32
    %24 = vector.broadcast %cst_12 : f32 to vector<16x16xf32>
    %25 = arith.select %23, %20, %24 : vector<16x16xi1>, vector<16x16xf32>
    %cst_13 = arith.constant dense<0xFF800000> : vector<16xf32>
    %26 = vector.multi_reduction <maximumf>, %25, %cst_13 [1] : vector<16x16xf32> to vector<16xf32>
    %27 = vector.shape_cast %26 : vector<16xf32> to vector<16x1xf32>
    %cst_14 = arith.constant 0.000000e+00 : f32
    %28 = vector.broadcast %cst_14 : f32 to vector<16x16xf32>
    %29 = arith.select %23, %28, %20 : vector<16x16xi1>, vector<16x16xf32>
    %cst_15 = arith.constant dense<0xFF800000> : vector<16xf32>
    %30 = vector.multi_reduction <maximumf>, %29, %cst_15 [1] : vector<16x16xf32> to vector<16xf32>
    %31 = vector.shape_cast %30 : vector<16xf32> to vector<16x1xf32>
    %32 = vector.shape_cast %27 : vector<16x1xf32> to vector<16x1xf32>
    %33 = vector.broadcast %32 : vector<16x1xf32> to vector<16x16xf32>
    %34 = vector.shape_cast %31 : vector<16x1xf32> to vector<16x1xf32>
    %35 = vector.broadcast %34 : vector<16x1xf32> to vector<16x16xf32>
    %36 = arith.select %23, %33, %35 : vector<16x16xi1>, vector<16x16xf32>
    %cst_16 = arith.constant 9.99999974E-6 : f32
    %37 = vector.broadcast %cst_16 : f32 to vector<16x16xf32>
    %38 = arith.addf %36, %37 : vector<16x16xf32>
    %39 = arith.divf %20, %38 : vector<16x16xf32>
    %c0_17 = arith.constant 0 : index
    %c0_18 = arith.constant 0 : index
    %c0_19 = arith.constant 0 : index
    %40 = vector.load %arg5[%c0_17, %c0_18, %c0_19] : memref<1x16x16xf32, #tpu.memory_space<vmem>>, vector<1x16x16xf32>
    %41 = vector.shape_cast %40 : vector<1x16x16xf32> to vector<16x16xf32>
    %42 = vector.shape_cast %39 : vector<16x16xf32> to vector<1x16x16xf32>
    tpu.vector_store %arg5[%c0_17, %c0_18, %c0_19], %42 {strides = array<i32>} : memref<1x16x16xf32, #tpu.memory_space<vmem>>, vector<1x16x16xf32>,
    return
  }
  func.func @transform_0(%arg0: i32, %arg1: i32) -> (i32, i32, i32) {
    %c0_i32 = arith.constant 0 : i32
    %c0_i32_0 = arith.constant 0 : i32
    %c0_i32_1 = arith.constant 0 : i32
    return %arg0, %c0_i32, %c0_i32_0 : i32, i32, i32
  }
  func.func @transform_1(%arg0: i32, %arg1: i32) -> (i32, i32, i32) {
    %c0_i32 = arith.constant 0 : i32
    %c0_i32_0 = arith.constant 0 : i32
    %c0_i32_1 = arith.constant 0 : i32
    %c0_i32_2 = arith.constant 0 : i32
    return %c0_i32, %c0_i32_0, %c0_i32_1 : i32, i32, i32
  }
  func.func @transform_2(%arg0: i32, %arg1: i32) -> (i32, i32) {
    %c0_i32 = arith.constant 0 : i32
    %c0_i32_0 = arith.constant 0 : i32
    %c0_i32_1 = arith.constant 0 : i32
    return %c0_i32, %c0_i32_0 : i32, i32
  }
  func.func @transform_3(%arg0: i32, %arg1: i32) -> (i32, i32, i32) {
    %c0_i32 = arith.constant 0 : i32
    %c0_i32_0 = arith.constant 0 : i32
    return %arg0, %arg1, %c0_i32 : i32, i32, i32
  }
}

</mosaic_0001>

<bundles_post_ra>
// kernel: tpu_custom_call.1
= control target key start
LH: loop header
LB: loop body
LE: loop exit
PB: predicated region body
PF: predicated region fallthrough
CT: control target
= control target key end

     0   :  { %s648_s12 = smov 0   ;;  %s650_s13 = smov 0   ;;  %s738_s0 = inlined_call_operand.vmem [shape: f32[2,33,16], index: 0, kind: input, shape index: {}]   ;;  %s739_s1 = inlined_call_operand.vmem [shape: f32[2,16,16], index: 1, kind: input, shape index: {}]   ;;  %s740_s2 = inlined_call_operand.vmem [shape: f32[1,16], index: 2, kind: input, shape index: {}]   ;;  %s741_s3 = inlined_call_operand.vmem [shape: f32[2,32,16], index: 3, kind: output, shape index: {}]  }
   0x1   :  { %s652_s14 = smov 0   ;;  %s654_s15 = smov 0  }
   0x2   :  { %s656_s16 = smov 0  }
   0x3 LB: > { %s22_s17 = sadd.s32 1, %s618_s14  ;;  %s25_s18 = sadd.s32 1, %s622_s15  ;;  %s626_s16 = sphi %s656_s16, %s13_s16   ;;  %s622_s15 = sphi %s654_s15, %s745_s15   ;;  %s618_s14 = sphi %s652_s14, %s744_s14   ;;  %s614_s13 = sphi %s650_s13, %s743_s13   ;;  %s610_s12 = sphi %s648_s12, %s742_s12  }
   0x4   : > { %p23_p0 = scmp.ge.s32.totalorder %s22_s17, 2  ;;  %p503_p1 = scmp.ge.s32.totalorder %s626_s16, 1 }
   0x5   : > { %p151_p2 = scmp.lt.s32.totalorder %s626_s16, 5 }
   0x6   : > { %s747_s17 = smov (%p23_p0, %s22_s17), 0  ;;  %s749_s18 = smov (!%p23_p0, %s25_s18), %s622_s15 }
   0x7   : > { %p152_p3 = pnand %p503_p1, %p151_p2  ;;  %p27_p4 = scmp.ge.s32.totalorder %s749_s18, 2 }
   0x8   : > { %p179_p5 = scmp.lt.s32.totalorder (!%p152_p3), %s614_s13, 1  ;;  %s508_s28 = sshll.u32 (!%p152_p3), %s610_s12, 4 }
   0x9   : > { %s751_s18 = smov (%p27_p4, %s749_s18), 0  ;;  %155 = sbr.rel (%p152_p3) target bundleno = 387 (0x183), region = 32 }
   0xa   : > { %s505_s8 = sshll.u32 (!%p152_p3), %s610_s12, 1 }
   0xb   : > { %p187_p6 = scmp.lt.s32.totalorder (!%p152_p3), %s505_s8, 3 }
   0xe   : > { %v513_v0 = vld [vmem:[%s739_s1 + $0x18] sm:$0xff]  ;;  %v199_v1 = vld [vmem:[%s739_s1 + $0x8] sm:$0xff]  ;;  %v512_v2 = vld [vmem:[%s739_s1 + $0x10] sm:$0xff]  ;;  %s753_s13 = smov (!%p179_p5, %s614_s13), 1  ;;  %vm207_vm0 = vcmask 130048   ;;  %v381_v11 = vlaneseq  ;;  %s755_s8 = smov (!%p187_p6, %s505_s8), 3 }
   0xf   : > { %529 = vmatprep.subr.mxu0 %v513_v0  ;;  %536 = vmatprep.subr.mxu1 %v199_v1  ;;  %v198_v3 = vld [vmem:[%s739_s1] sm:$0xff]  ;;  %s543_s27 = smul.u32 40, %s753_s13  ;;  %s506_s9 = sshll.u32 %s753_s13, 2 }
  0x10   : > { %530 = vmatpush3.msra.mxu0 %v513_v0  ;;  %537 = vmatpush3.msra.mxu1 %v199_v1  ;;  %v518_v10 = vld [vmem:[%s740_s2] ss:$0 sm:$0xff]  ;;  %v382_v17 = vand.u32 127, %v381_v11  ;;  %s190_s10 = sadd.s32 %s506_s9, %s755_s8 }
  0x11   : > { %531 = vmatprep.subr.mxu0 %v512_v2  ;;  %538 = vmatprep.subr.mxu1 %v198_v3  ;;  %s183_s4 = scalar_lea.vmem %s738_s0, %s543_s27  ;;  %s507_s11 = sshll.u32 %s190_s10, 3 }
  0x12   : > { %532 = vmatpush3.msra.mxu0 %v512_v2  ;;  %539 = vmatpush3.msra.mxu1 %v198_v3  ;;  %s195_s5 = scalar_lea.vmem %s183_s4, %s508_s28  ;;  %vm383_vm1 = vcmp.lt.s32.totalorder %v382_v17, 8  ;;  %s192_s20 = scalar_lea.vmem %s741_s3, %s507_s11 }
  0x13   : > { %v510_v4 = vld [vmem:[%s195_s5 + $0x1] sm:$0xff]  ;;  %v511_v6 = vld [vmem:[%s195_s5 + $0x9] sm:$0xff] }
  0x14   : > { %v196_v5 = vld [vmem:[%s195_s5] sm:$0xff]  ;;  %533 = vmatprep.mubr.msk.f32.mxu0 %vm207_vm0, %v510_v4  ;;  %v197_v7 = vld [vmem:[%s195_s5 + $0x8] sm:$0xff] }
  0x15   : > { %540 = vmatprep.mubr.msk.f32.mxu1 %vm207_vm0, %v196_v5  ;;  %534 = vmatmul.mubr.msk.f32.vlgmr.msra.gmra.mxu0 %vm207_vm0, %v511_v6 }
  0x16   : > { %541 = vmatmul.mubr.msk.f32.vlgmr.msra.gmra.mxu1 %vm207_vm0, %v197_v7 }
  0xd5   : > { %v535_v8 = vpop.f32.mrf.mxu0 }
  0xd6   : > { %v542_v9 = vpop.f32.mrf.mxu1 }
  0xd7   : > { %v367_v12 = vadd.f32 %v542_v9, %v535_v8  ;;  %v280_v13 = vpop.f32.mrf.mxu0 }
  0xd8   : > { %v361_v14 = vpop.f32.mrf.mxu1 }
  0xd9   : > { %v378_v15 = vadd.f32 %v518_v10, %v367_v12  ;;  %v362_v16 = vadd.f32 %v361_v14, %v280_v13 }
  0xdb   : > { %v377_v18 = vadd.f32 %v518_v10, %v362_v16  ;;  %v380_v19 = vmax.f32 %v378_v15, 0.0 }
  0xdd   : > { %v379_v20 = vmax.f32 %v377_v18, 0.0  ;;  %v393_v25 = vsel %vm383_vm1, 0.0, %v380_v19  ;;  %v385_v26 = vsel %vm383_vm1, %v380_v19, 0.0 }
  0xde   : > { %v397_v27 = vsel %vm207_vm0, %v393_v25, -inf  ;;  %v389_v28 = vsel %vm207_vm0, %v385_v26, -inf }
  0xdf   : > { %v392_v21 = vsel %vm383_vm1, 0.0, %v379_v20  ;;  %v384_v22 = vsel %vm383_vm1, %v379_v20, 0.0 }
  0xe0   : > { %v394_v23 = vsel %vm207_vm0, %v392_v21, -inf  ;;  %v386_v24 = vsel %vm207_vm0, %v384_v22, -inf }
  0xe1   : > { %395 = vmax.xlane.f32.xlu1 %v394_v23  ;;  %387 = vmax.xlane.f32.xlu0 %v386_v24 }
  0xe5   : > { %398 = vmax.xlane.f32.xlu1 %v397_v27  ;;  %390 = vmax.xlane.f32.xlu0 %v389_v28 }
 0x16a   : > { %v396_v29 = vpop.xlane.xlu1 %395  ;;  %v388_v30 = vpop.xlane.xlu0 %387 }
 0x16b   : > { %v400_v31 = vsel %vm383_vm1, %v388_v30, %v396_v29 }
 0x16c   : > { %v402_v32 = vadd.f32 1e-05, %v400_v31 }
 0x16e   : > { %584 = vrcp.f32 %v402_v32  ;;  %v399_v33 = vpop.xlane.xlu1 %398  ;;  %v391_v34 = vpop.xlane.xlu0 %390 }
 0x16f   : > { %v401_v35 = vsel %vm383_vm1, %v391_v34, %v399_v33 }
 0x170   : > { %v403_v36 = vadd.f32 1e-05, %v401_v35 }
 0x172   : > { %586 = vrcp.f32 %v403_v36 }
 0x17b   : > { %v585_v37 = vpop.eup %584 }
 0x17c   : > { %v405_v38 = vmul.f32 %v585_v37, %v379_v20 }
 0x17e   : > { %408 = vst.msk [vmem:[%s192_s20] sm:$0xff] %vm207_vm0, %v405_v38 }
 0x17f   : > { %v587_v39 = vpop.eup %586 }
 0x180   : > { %v407_v40 = vmul.f32 %v587_v39, %v380_v19 }
 0x182   : > { %409 = vst.msk [vmem:[%s192_s20 + $0x8] sm:$0xff] %vm207_vm0, %v407_v40 }
 0x183 PF: > { %s13_s16 = sadd.s32 1, %s626_s16   ;;  %s742_s12 = smov %s618_s14 }
 0x184   : > { %p10_p7 = scmp.ge.s32.totalorder %s13_s16, 6   ;;  %s743_s13 = smov %s622_s15 }
 0x185   : > { %s744_s14 = smov %s747_s17  ;;  %s745_s15 = smov %s751_s18 }
 0x186   :  { %12 = sbr.rel (!%p10_p7) target bundleno = 3 (0x3), region = 65 }

</bundles_post_ra>
